<compile_context>
chip_gen: v6e
topology: v6e:2x2x1
jax: 0.10.0
libtpu: 0.0.40
codegen_flags: <defaults>
</compile_context>

<pallas_src>
import functools

import jax
import jax.numpy as jnp
from jax.experimental import pallas as pl
from jax.experimental.pallas import tpu as pltpu

LN_EPS = 1e-5  # PyTorch nn.LayerNorm default
_INV_SQRT2 = 0.7071067811865476


def _round_up(x, m):
    return ((x + m - 1) // m) * m


def _gelu_exact(x):
    # PyTorch nn.GELU() default = exact erf formulation (computed in f32 on the EUP).
    return 0.5 * x * (1.0 + jax.lax.erf(x * _INV_SQRT2))


def _make_mlp_kernel(n_hidden, compute_dtype):
    """Fused kernel: n_hidden x (Linear -> GELU -> LayerNorm) -> Linear.

    Ref layout: x_ref, (w_ref, bgb_ref) * n_hidden, wf_ref, bf_ref, o_ref
      w_ref   : [Cin, Cout]  (bf16)   bgb_ref : [3, Cout] f32 = [bias; gamma; beta]
      wf_ref  : [Cin, Nout]  (bf16)   bf_ref  : [1, Nout] f32
    """

    def kernel(*refs):
        x_ref = refs[0]
        o_ref = refs[-1]
        p = refs[1:-1]

        h = x_ref[...].astype(compute_dtype)
        for li in range(n_hidden):
            w_ref = p[2 * li]
            bgb_ref = p[2 * li + 1]
            # MXU matmul in bf16 with f32 accumulation.
            y = jnp.dot(h, w_ref[...], preferred_element_type=jnp.float32)
            y = y + bgb_ref[0:1, :]
            g = _gelu_exact(y)
            # Dropout(p) is identity in eval mode.
            mu = jnp.mean(g, axis=-1, keepdims=True)
            var = jnp.mean(jnp.square(g - mu), axis=-1, keepdims=True)
            inv = jax.lax.rsqrt(var + LN_EPS)          # [tile_b, 1]
            hn = (g - mu) * inv                        # normalized
            h = (hn * bgb_ref[1:2, :] + bgb_ref[2:3, :]).astype(compute_dtype)

        wf_ref = p[2 * n_hidden]
        bf_ref = p[2 * n_hidden + 1]
        y = jnp.dot(h, wf_ref[...], preferred_element_type=jnp.float32) + bf_ref[...]
        o_ref[...] = y.astype(o_ref.dtype)

    return kernel


def mlp_forward(x, packed, *, tile_b=256):
    """Fused MLP forward.

    x      : [B, n_inputs] f32
    packed : {"hidden": [(w_bf16 [Cin,Cout], bgb_f32 [3,Cout]), ...],
              "final" : (wf_bf16 [Cin,Nout], bf_f32 [1,Nout])}
    """
    hidden = packed["hidden"]
    wf, bf = packed["final"]
    n_hidden = len(hidden)

    B, n_in = x.shape
    n_out = wf.shape[1]

    # Batch tiling: tile_b must be a multiple of 8 (sublane); pad batch to a multiple
    # of the tile and slice the padding back off at the end.
    tile_b = max(8, min(tile_b, _round_up(B, 8)))
    tile_b = _round_up(tile_b, 8)
    Bp = _round_up(B, tile_b)
    if Bp != B:
        x = jnp.pad(x, ((0, Bp - B), (0, 0)))
    grid = (Bp // tile_b,)

    act_map = lambda i: (i, 0)       # activation tile walks the batch
    resident = lambda i: (0, 0)      # weights stay pinned in VMEM across grid steps

    in_specs = [pl.BlockSpec((tile_b, n_in), act_map)]
    inputs = [x]
    flops = 0
    transcendentals = 0
    bytes_accessed = x.size * x.dtype.itemsize
    # Pipeline buffers: input tile + output tile + every weight, double-buffered.
    vmem_need = 2 * tile_b * n_in * 4 + 2 * tile_b * n_out * 4
    max_dim = max(n_in, n_out)

    for w, bgb in hidden:
        in_specs.append(pl.BlockSpec(w.shape, resident))
        in_specs.append(pl.BlockSpec(bgb.shape, resident))
        inputs.extend([w, bgb])
        flops += 2 * Bp * w.shape[0] * w.shape[1]
        transcendentals += Bp * w.shape[1]  # erf per hidden activation
        bytes_accessed += w.size * w.dtype.itemsize + bgb.size * bgb.dtype.itemsize
        vmem_need += 2 * (w.size * w.dtype.itemsize + bgb.size * bgb.dtype.itemsize)
        max_dim = max(max_dim, w.shape[1])

    in_specs.append(pl.BlockSpec(wf.shape, resident))
    in_specs.append(pl.BlockSpec(bf.shape, resident))
    inputs.extend([wf, bf])
    flops += 2 * Bp * wf.shape[0] * wf.shape[1]
    bytes_accessed += wf.size * wf.dtype.itemsize + bf.size * bf.dtype.itemsize
    bytes_accessed += Bp * n_out * 4  # f32 output
    vmem_need += 2 * (wf.size * wf.dtype.itemsize + bf.size * bf.dtype.itemsize)

    # Headroom for the live f32/bf16 intermediates of one layer inside the body.
    vmem_need += 6 * tile_b * max_dim * 4
    vmem_limit = int(min(max(vmem_need, 32 * 2**20), 64 * 2**20))

    out = pl.pallas_call(
        _make_mlp_kernel(n_hidden, jnp.bfloat16),
        out_shape=jax.ShapeDtypeStruct((Bp, n_out), jnp.float32),
        grid=grid,
        in_specs=in_specs,
        out_specs=pl.BlockSpec((tile_b, n_out), act_map),
        compiler_params=pltpu.CompilerParams(
            dimension_semantics=("parallel",),  # shards the batch grid across v7x's 2 TCs
            vmem_limit_bytes=vmem_limit,
        ),
        cost_estimate=pl.CostEstimate(
            flops=int(flops),
            transcendentals=int(transcendentals),
            bytes_accessed=int(bytes_accessed),
        ),
    )(*inputs)

    return out[:B]


# ----------------------------------------------------------------------------- params


def init_mlp_params(key, n_inputs, n_outputs, layer_dims):
    """Deterministic synthetic init (PyTorch Linear-like uniform fan_in scaling), f32."""
    params = []
    c = n_inputs
    for d in layer_dims:
        key, kw, kb = jax.random.split(key, 3)
        bound = 1.0 / float(jnp.sqrt(c))
        w = jax.random.uniform(kw, (c, d), jnp.float32, -bound, bound)
        b = jax.random.uniform(kb, (1, d), jnp.float32, -bound, bound)
        gamma = jnp.ones((1, d), jnp.float32)
        beta = jnp.zeros((1, d), jnp.float32)
        params.append(("hidden", w, b, gamma, beta))
        c = d
    key, kw, kb = jax.random.split(key, 3)
    bound = 1.0 / float(jnp.sqrt(c))
    w = jax.random.uniform(kw, (c, n_outputs), jnp.float32, -bound, bound)
    b = jax.random.uniform(kb, (1, n_outputs), jnp.float32, -bound, bound)
    params.append(("final", w, b))
    return params


def pack_params(params):
    """Kernel-ready layout: bf16 matmul weights, (3, d)-packed f32 bias/gamma/beta."""
    hidden = []
    final = None
    for p in params:
        if p[0] == "hidden":
            _, w, b, g, beta = p
            bgb = jnp.concatenate([b, g, beta], axis=0).astype(jnp.float32)  # [3, d]
            hidden.append((w.astype(jnp.bfloat16), bgb))
        else:
            _, w, b = p
            final = (w.astype(jnp.bfloat16), b.astype(jnp.float32))
    return {"hidden": hidden, "final": final}


def mlp_apply(packed, spectrum, *, tile_b=256):
    return jax.jit(functools.partial(mlp_forward, tile_b=tile_b))(
        spectrum["intensity"], packed
    )


# --------------------------------------------------------------------------- reference


def _reference(x, packed):
    """Pure-JAX reference mirroring the kernel's numerics (bf16 matmul, f32 elsewhere)."""
    h = x
    for w, bgb in packed["hidden"]:
        b, g, beta = bgb[0:1, :], bgb[1:2, :], bgb[2:3, :]
        y = jnp.dot(h.astype(jnp.bfloat16), w, preferred_element_type=jnp.float32) + b
        a = 0.5 * y * (1.0 + jax.lax.erf(y * _INV_SQRT2))
        mu = jnp.mean(a, axis=-1, keepdims=True)
        var = jnp.mean(jnp.square(a - mu), axis=-1, keepdims=True)
        h = (a - mu) * jax.lax.rsqrt(var + LN_EPS) * g + beta
    wf, bf = packed["final"]
    return jnp.dot(h.astype(jnp.bfloat16), wf, preferred_element_type=jnp.float32) + bf


if __name__ == "__main__":
    # Small shapes consistent with the module: batch=20, n_inputs=256,
    # layer_dims=[128, 128, 128], n_outputs=128.  tile_b=8 exercises a multi-step
    # parallel batch grid plus padding/unpadding (20 -> 24 rows).
    B, N_IN, N_OUT = 20, 256, 128
    LAYER_DIMS = [128, 128, 128]
    TILE_B = 8

    key = jax.random.PRNGKey(0)
    key, kx = jax.random.split(key)
    x = jax.random.normal(kx, (B, N_IN), jnp.float32)
    spectrum = {"intensity": x}

    params = init_mlp_params(key, N_IN, N_OUT, LAYER_DIMS)
    packed = pack_params(params)

    out = mlp_apply(packed, spectrum, tile_b=TILE_B)
    out = jax.block_until_ready(out)

    ref = _reference(x, packed)
    assert out.shape == (B, N_OUT), out.shape
    max_err = float(jnp.max(jnp.abs(out - ref)))
    assert jnp.allclose(out, ref, atol=5e-3, rtol=5e-3), max_err

    print("KERNEL_OK")
</pallas_src>

<mosaic_0001>
module attributes {stable_mosaic.version = 11 : i64} {
  func.func @kernel(%arg0: i32, %arg1: memref<8x256xf32, #tpu.memory_space<vmem>>, %arg2: memref<256x128xbf16, #tpu.memory_space<vmem>>, %arg3: memref<3x128xf32, #tpu.memory_space<vmem>>, %arg4: memref<128x128xbf16, #tpu.memory_space<vmem>>, %arg5: memref<3x128xf32, #tpu.memory_space<vmem>>, %arg6: memref<128x128xbf16, #tpu.memory_space<vmem>>, %arg7: memref<3x128xf32, #tpu.memory_space<vmem>>, %arg8: memref<128x128xbf16, #tpu.memory_space<vmem>>, %arg9: memref<1x128xf32, #tpu.memory_space<vmem>>, %arg10: memref<8x128xf32, #tpu.memory_space<vmem>>) attributes {dimension_semantics = [#tpu.dimension_semantics<parallel>], iteration_bounds = array<i64: 3>, scalar_prefetch = 0 : i64, scratch_operands = 0 : i64, tpu.core_type = #tpu.core_type<tc>, window_params = [{transform_indices = @transform_0, window_bounds = array<i64: 8, 256>}, {pipeline_mode = #tpu.pipeline_mode<synchronous>, transform_indices = @transform_1, window_bounds = array<i64: 256, 128>}, {pipeline_mode = #tpu.pipeline_mode<synchronous>, transform_indices = @transform_2, window_bounds = array<i64: 3, 128>}, {pipeline_mode = #tpu.pipeline_mode<synchronous>, transform_indices = @transform_3, window_bounds = array<i64: 128, 128>}, {pipeline_mode = #tpu.pipeline_mode<synchronous>, transform_indices = @transform_4, window_bounds = array<i64: 3, 128>}, {pipeline_mode = #tpu.pipeline_mode<synchronous>, transform_indices = @transform_5, window_bounds = array<i64: 128, 128>}, {pipeline_mode = #tpu.pipeline_mode<synchronous>, transform_indices = @transform_6, window_bounds = array<i64: 3, 128>}, {pipeline_mode = #tpu.pipeline_mode<synchronous>, transform_indices = @transform_7, window_bounds = array<i64: 128, 128>}, {pipeline_mode = #tpu.pipeline_mode<synchronous>, transform_indices = @transform_8, window_bounds = array<i64: 1, 128>}, {transform_indices = @transform_9, window_bounds = array<i64: 8, 128>}]} {
    %c0 = arith.constant 0 : index
    %c0_0 = arith.constant 0 : index
    %0 = vector.load %arg1[%c0, %c0_0] : memref<8x256xf32, #tpu.memory_space<vmem>>, vector<8x256xf32>
    %1 = arith.truncf %0 : vector<8x256xf32> to vector<8x256xbf16>
    %c0_1 = arith.constant 0 : index
    %c0_2 = arith.constant 0 : index
    %2 = vector.load %arg2[%c0_1, %c0_2] : memref<256x128xbf16, #tpu.memory_space<vmem>>, vector<256x128xbf16>
    %cst = arith.constant dense<0.000000e+00> : vector<8x128xf32>
    %3 = tpu.matmul %1, %2, %cst {dimension_numbers = #tpu.dot_dimension_numbers<[1], [0], [0], [1], [0, 0, 1, 1], [], []>} : vector<8x256xbf16>, vector<256x128xbf16>, vector<8x128xf32> -> vector<8x128xf32>
    %c0_3 = arith.constant 0 : index
    %c0_4 = arith.constant 0 : index
    %4 = vector.load %arg3[%c0_3, %c0_4] : memref<3x128xf32, #tpu.memory_space<vmem>>, vector<1x128xf32>
    %5 = vector.broadcast %4 : vector<1x128xf32> to vector<8x128xf32>
    %6 = arith.addf %3, %5 : vector<8x128xf32>
    %cst_5 = arith.constant 5.000000e-01 : f32
    %7 = vector.broadcast %cst_5 : f32 to vector<8x128xf32>
    %8 = arith.mulf %7, %6 : vector<8x128xf32>
    %cst_6 = arith.constant 0.707106769 : f32
    %9 = vector.broadcast %cst_6 : f32 to vector<8x128xf32>
    %10 = arith.mulf %6, %9 : vector<8x128xf32>
    %11 = math.erf %10 : vector<8x128xf32>
    %cst_7 = arith.constant 1.000000e+00 : f32
    %12 = vector.broadcast %cst_7 : f32 to vector<8x128xf32>
    %13 = arith.addf %12, %11 : vector<8x128xf32>
    %14 = arith.mulf %8, %13 : vector<8x128xf32>
    %cst_8 = arith.constant dense<0.000000e+00> : vector<8xf32>
    %15 = vector.multi_reduction <add>, %14, %cst_8 [1] : vector<8x128xf32> to vector<8xf32>
    %16 = vector.shape_cast %15 : vector<8xf32> to vector<8x1xf32>
    %cst_9 = arith.constant 1.280000e+02 : f32
    %17 = vector.broadcast %cst_9 : f32 to vector<8x1xf32>
    %18 = arith.divf %16, %17 : vector<8x1xf32>
    %19 = vector.broadcast %18 : vector<8x1xf32> to vector<8x128xf32>
    %20 = arith.subf %14, %19 : vector<8x128xf32>
    %21 = arith.mulf %20, %20 : vector<8x128xf32>
    %cst_10 = arith.constant dense<0.000000e+00> : vector<8xf32>
    %22 = vector.multi_reduction <add>, %21, %cst_10 [1] : vector<8x128xf32> to vector<8xf32>
    %23 = vector.shape_cast %22 : vector<8xf32> to vector<8x1xf32>
    %cst_11 = arith.constant 1.280000e+02 : f32
    %24 = vector.broadcast %cst_11 : f32 to vector<8x1xf32>
    %25 = arith.divf %23, %24 : vector<8x1xf32>
    %cst_12 = arith.constant 9.99999974E-6 : f32
    %26 = vector.broadcast %cst_12 : f32 to vector<8x1xf32>
    %27 = arith.addf %25, %26 : vector<8x1xf32>
    %28 = math.rsqrt %27 : vector<8x1xf32>
    %29 = vector.broadcast %18 : vector<8x1xf32> to vector<8x128xf32>
    %30 = arith.subf %14, %29 : vector<8x128xf32>
    %31 = vector.broadcast %28 : vector<8x1xf32> to vector<8x128xf32>
    %32 = arith.mulf %30, %31 : vector<8x128xf32>
    %c1 = arith.constant 1 : index
    %c0_13 = arith.constant 0 : index
    %33 = vector.load %arg3[%c1, %c0_13] : memref<3x128xf32, #tpu.memory_space<vmem>>, vector<1x128xf32>
    %34 = vector.broadcast %33 : vector<1x128xf32> to vector<8x128xf32>
    %35 = arith.mulf %32, %34 : vector<8x128xf32>
    %c2 = arith.constant 2 : index
    %c0_14 = arith.constant 0 : index
    %36 = vector.load %arg3[%c2, %c0_14] : memref<3x128xf32, #tpu.memory_space<vmem>>, vector<1x128xf32>
    %37 = vector.broadcast %36 : vector<1x128xf32> to vector<8x128xf32>
    %38 = arith.addf %35, %37 : vector<8x128xf32>
    %39 = arith.truncf %38 : vector<8x128xf32> to vector<8x128xbf16>
    %c0_15 = arith.constant 0 : index
    %c0_16 = arith.constant 0 : index
    %40 = vector.load %arg4[%c0_15, %c0_16] : memref<128x128xbf16, #tpu.memory_space<vmem>>, vector<128x128xbf16>
    %cst_17 = arith.constant dense<0.000000e+00> : vector<8x128xf32>
    %41 = tpu.matmul %39, %40, %cst_17 {dimension_numbers = #tpu.dot_dimension_numbers<[1], [0], [0], [1], [0, 0, 1, 1], [], []>} : vector<8x128xbf16>, vector<128x128xbf16>, vector<8x128xf32> -> vector<8x128xf32>
    %c0_18 = arith.constant 0 : index
    %c0_19 = arith.constant 0 : index
    %42 = vector.load %arg5[%c0_18, %c0_19] : memref<3x128xf32, #tpu.memory_space<vmem>>, vector<1x128xf32>
    %43 = vector.broadcast %42 : vector<1x128xf32> to vector<8x128xf32>
    %44 = arith.addf %41, %43 : vector<8x128xf32>
    %cst_20 = arith.constant 5.000000e-01 : f32
    %45 = vector.broadcast %cst_20 : f32 to vector<8x128xf32>
    %46 = arith.mulf %45, %44 : vector<8x128xf32>
    %cst_21 = arith.constant 0.707106769 : f32
    %47 = vector.broadcast %cst_21 : f32 to vector<8x128xf32>
    %48 = arith.mulf %44, %47 : vector<8x128xf32>
    %49 = math.erf %48 : vector<8x128xf32>
    %cst_22 = arith.constant 1.000000e+00 : f32
    %50 = vector.broadcast %cst_22 : f32 to vector<8x128xf32>
    %51 = arith.addf %50, %49 : vector<8x128xf32>
    %52 = arith.mulf %46, %51 : vector<8x128xf32>
    %cst_23 = arith.constant dense<0.000000e+00> : vector<8xf32>
    %53 = vector.multi_reduction <add>, %52, %cst_23 [1] : vector<8x128xf32> to vector<8xf32>
    %54 = vector.shape_cast %53 : vector<8xf32> to vector<8x1xf32>
    %cst_24 = arith.constant 1.280000e+02 : f32
    %55 = vector.broadcast %cst_24 : f32 to vector<8x1xf32>
    %56 = arith.divf %54, %55 : vector<8x1xf32>
    %57 = vector.broadcast %56 : vector<8x1xf32> to vector<8x128xf32>
    %58 = arith.subf %52, %57 : vector<8x128xf32>
    %59 = arith.mulf %58, %58 : vector<8x128xf32>
    %cst_25 = arith.constant dense<0.000000e+00> : vector<8xf32>
    %60 = vector.multi_reduction <add>, %59, %cst_25 [1] : vector<8x128xf32> to vector<8xf32>
    %61 = vector.shape_cast %60 : vector<8xf32> to vector<8x1xf32>
    %cst_26 = arith.constant 1.280000e+02 : f32
    %62 = vector.broadcast %cst_26 : f32 to vector<8x1xf32>
    %63 = arith.divf %61, %62 : vector<8x1xf32>
    %cst_27 = arith.constant 9.99999974E-6 : f32
    %64 = vector.broadcast %cst_27 : f32 to vector<8x1xf32>
    %65 = arith.addf %63, %64 : vector<8x1xf32>
    %66 = math.rsqrt %65 : vector<8x1xf32>
    %67 = vector.broadcast %56 : vector<8x1xf32> to vector<8x128xf32>
    %68 = arith.subf %52, %67 : vector<8x128xf32>
    %69 = vector.broadcast %66 : vector<8x1xf32> to vector<8x128xf32>
    %70 = arith.mulf %68, %69 : vector<8x128xf32>
    %c1_28 = arith.constant 1 : index
    %c0_29 = arith.constant 0 : index
    %71 = vector.load %arg5[%c1_28, %c0_29] : memref<3x128xf32, #tpu.memory_space<vmem>>, vector<1x128xf32>
    %72 = vector.broadcast %71 : vector<1x128xf32> to vector<8x128xf32>
    %73 = arith.mulf %70, %72 : vector<8x128xf32>
    %c2_30 = arith.constant 2 : index
    %c0_31 = arith.constant 0 : index
    %74 = vector.load %arg5[%c2_30, %c0_31] : memref<3x128xf32, #tpu.memory_space<vmem>>, vector<1x128xf32>
    %75 = vector.broadcast %74 : vector<1x128xf32> to vector<8x128xf32>
    %76 = arith.addf %73, %75 : vector<8x128xf32>
    %77 = arith.truncf %76 : vector<8x128xf32> to vector<8x128xbf16>
    %c0_32 = arith.constant 0 : index
    %c0_33 = arith.constant 0 : index
    %78 = vector.load %arg6[%c0_32, %c0_33] : memref<128x128xbf16, #tpu.memory_space<vmem>>, vector<128x128xbf16>
    %cst_34 = arith.constant dense<0.000000e+00> : vector<8x128xf32>
    %79 = tpu.matmul %77, %78, %cst_34 {dimension_numbers = #tpu.dot_dimension_numbers<[1], [0], [0], [1], [0, 0, 1, 1], [], []>} : vector<8x128xbf16>, vector<128x128xbf16>, vector<8x128xf32> -> vector<8x128xf32>
    %c0_35 = arith.constant 0 : index
    %c0_36 = arith.constant 0 : index
    %80 = vector.load %arg7[%c0_35, %c0_36] : memref<3x128xf32, #tpu.memory_space<vmem>>, vector<1x128xf32>
    %81 = vector.broadcast %80 : vector<1x128xf32> to vector<8x128xf32>
    %82 = arith.addf %79, %81 : vector<8x128xf32>
    %cst_37 = arith.constant 5.000000e-01 : f32
    %83 = vector.broadcast %cst_37 : f32 to vector<8x128xf32>
    %84 = arith.mulf %83, %82 : vector<8x128xf32>
    %cst_38 = arith.constant 0.707106769 : f32
    %85 = vector.broadcast %cst_38 : f32 to vector<8x128xf32>
    %86 = arith.mulf %82, %85 : vector<8x128xf32>
    %87 = math.erf %86 : vector<8x128xf32>
    %cst_39 = arith.constant 1.000000e+00 : f32
    %88 = vector.broadcast %cst_39 : f32 to vector<8x128xf32>
    %89 = arith.addf %88, %87 : vector<8x128xf32>
    %90 = arith.mulf %84, %89 : vector<8x128xf32>
    %cst_40 = arith.constant dense<0.000000e+00> : vector<8xf32>
    %91 = vector.multi_reduction <add>, %90, %cst_40 [1] : vector<8x128xf32> to vector<8xf32>
    %92 = vector.shape_cast %91 : vector<8xf32> to vector<8x1xf32>
    %cst_41 = arith.constant 1.280000e+02 : f32
    %93 = vector.broadcast %cst_41 : f32 to vector<8x1xf32>
    %94 = arith.divf %92, %93 : vector<8x1xf32>
    %95 = vector.broadcast %94 : vector<8x1xf32> to vector<8x128xf32>
    %96 = arith.subf %90, %95 : vector<8x128xf32>
    %97 = arith.mulf %96, %96 : vector<8x128xf32>
    %cst_42 = arith.constant dense<0.000000e+00> : vector<8xf32>
    %98 = vector.multi_reduction <add>, %97, %cst_42 [1] : vector<8x128xf32> to vector<8xf32>
    %99 = vector.shape_cast %98 : vector<8xf32> to vector<8x1xf32>
    %cst_43 = arith.constant 1.280000e+02 : f32
    %100 = vector.broadcast %cst_43 : f32 to vector<8x1xf32>
    %101 = arith.divf %99, %100 : vector<8x1xf32>
    %cst_44 = arith.constant 9.99999974E-6 : f32
    %102 = vector.broadcast %cst_44 : f32 to vector<8x1xf32>
    %103 = arith.addf %101, %102 : vector<8x1xf32>
    %104 = math.rsqrt %103 : vector<8x1xf32>
    %105 = vector.broadcast %94 : vector<8x1xf32> to vector<8x128xf32>
    %106 = arith.subf %90, %105 : vector<8x128xf32>
    %107 = vector.broadcast %104 : vector<8x1xf32> to vector<8x128xf32>
    %108 = arith.mulf %106, %107 : vector<8x128xf32>
    %c1_45 = arith.constant 1 : index
    %c0_46 = arith.constant 0 : index
    %109 = vector.load %arg7[%c1_45, %c0_46] : memref<3x128xf32, #tpu.memory_space<vmem>>, vector<1x128xf32>
    %110 = vector.broadcast %109 : vector<1x128xf32> to vector<8x128xf32>
    %111 = arith.mulf %108, %110 : vector<8x128xf32>
    %c2_47 = arith.constant 2 : index
    %c0_48 = arith.constant 0 : index
    %112 = vector.load %arg7[%c2_47, %c0_48] : memref<3x128xf32, #tpu.memory_space<vmem>>, vector<1x128xf32>
    %113 = vector.broadcast %112 : vector<1x128xf32> to vector<8x128xf32>
    %114 = arith.addf %111, %113 : vector<8x128xf32>
    %115 = arith.truncf %114 : vector<8x128xf32> to vector<8x128xbf16>
    %c0_49 = arith.constant 0 : index
    %c0_50 = arith.constant 0 : index
    %116 = vector.load %arg8[%c0_49, %c0_50] : memref<128x128xbf16, #tpu.memory_space<vmem>>, vector<128x128xbf16>
    %cst_51 = arith.constant dense<0.000000e+00> : vector<8x128xf32>
    %117 = tpu.matmul %115, %116, %cst_51 {dimension_numbers = #tpu.dot_dimension_numbers<[1], [0], [0], [1], [0, 0, 1, 1], [], []>} : vector<8x128xbf16>, vector<128x128xbf16>, vector<8x128xf32> -> vector<8x128xf32>
    %c0_52 = arith.constant 0 : index
    %c0_53 = arith.constant 0 : index
    %118 = vector.load %arg9[%c0_52, %c0_53] : memref<1x128xf32, #tpu.memory_space<vmem>>, vector<1x128xf32>
    %119 = vector.broadcast %118 : vector<1x128xf32> to vector<8x128xf32>
    %120 = arith.addf %117, %119 : vector<8x128xf32>
    %c0_54 = arith.constant 0 : index
    %c0_55 = arith.constant 0 : index
    %121 = vector.load %arg10[%c0_54, %c0_55] : memref<8x128xf32, #tpu.memory_space<vmem>>, vector<8x128xf32>
    tpu.vector_store %arg10[%c0_54, %c0_55], %120 {strides = array<i32>} : memref<8x128xf32, #tpu.memory_space<vmem>>, vector<8x128xf32>,
    return
  }
  func.func @transform_0(%arg0: i32) -> (i32, i32) {
    %c0_i32 = arith.constant 0 : i32
    %c0_i32_0 = arith.constant 0 : i32
    return %arg0, %c0_i32 : i32, i32
  }
  func.func @transform_1(%arg0: i32) -> (i32, i32) {
    %c0_i32 = arith.constant 0 : i32
    %c0_i32_0 = arith.constant 0 : i32
    %c0_i32_1 = arith.constant 0 : i32
    return %c0_i32, %c0_i32_0 : i32, i32
  }
  func.func @transform_2(%arg0: i32) -> (i32, i32) {
    %c0_i32 = arith.constant 0 : i32
    %c0_i32_0 = arith.constant 0 : i32
    %c0_i32_1 = arith.constant 0 : i32
    return %c0_i32, %c0_i32_0 : i32, i32
  }
  func.func @transform_3(%arg0: i32) -> (i32, i32) {
    %c0_i32 = arith.constant 0 : i32
    %c0_i32_0 = arith.constant 0 : i32
    %c0_i32_1 = arith.constant 0 : i32
    return %c0_i32, %c0_i32_0 : i32, i32
  }
  func.func @transform_4(%arg0: i32) -> (i32, i32) {
    %c0_i32 = arith.constant 0 : i32
    %c0_i32_0 = arith.constant 0 : i32
    %c0_i32_1 = arith.constant 0 : i32
    return %c0_i32, %c0_i32_0 : i32, i32
  }
  func.func @transform_5(%arg0: i32) -> (i32, i32) {
    %c0_i32 = arith.constant 0 : i32
    %c0_i32_0 = arith.constant 0 : i32
    %c0_i32_1 = arith.constant 0 : i32
    return %c0_i32, %c0_i32_0 : i32, i32
  }
  func.func @transform_6(%arg0: i32) -> (i32, i32) {
    %c0_i32 = arith.constant 0 : i32
    %c0_i32_0 = arith.constant 0 : i32
    %c0_i32_1 = arith.constant 0 : i32
    return %c0_i32, %c0_i32_0 : i32, i32
  }
  func.func @transform_7(%arg0: i32) -> (i32, i32) {
    %c0_i32 = arith.constant 0 : i32
    %c0_i32_0 = arith.constant 0 : i32
    %c0_i32_1 = arith.constant 0 : i32
    return %c0_i32, %c0_i32_0 : i32, i32
  }
  func.func @transform_8(%arg0: i32) -> (i32, i32) {
    %c0_i32 = arith.constant 0 : i32
    %c0_i32_0 = arith.constant 0 : i32
    %c0_i32_1 = arith.constant 0 : i32
    return %c0_i32, %c0_i32_0 : i32, i32
  }
  func.func @transform_9(%arg0: i32) -> (i32, i32) {
    %c0_i32 = arith.constant 0 : i32
    %c0_i32_0 = arith.constant 0 : i32
    return %arg0, %c0_i32 : i32, i32
  }
}

</mosaic_0001>

<bundles_post_ra>
// kernel: mlp_forward.1
= control target key start
LH: loop header
LB: loop body
LE: loop exit
PB: predicated region body
PF: predicated region fallthrough
CT: control target
= control target key end

     0   :  { %14 = vsyncpa [#allocation3], 0  ;;  %s1816_s0 = inlined_call_operand.vmem [shape: f32[24,256], index: 0, kind: input, shape index: {}]   ;;  %s1817_s1 = inlined_call_operand.hbm [shape: bf16[256,128], index: 1, kind: input, shape index: {}]   ;;  %s1818_s2 = inlined_call_operand.vmem [shape: f32[3,128], index: 2, kind: input, shape index: {}]   ;;  %s1819_s3 = inlined_call_operand.vmem [shape: bf16[128,128], index: 3, kind: input, shape index: {}]   ;;  %s1820_s4 = inlined_call_operand.vmem [shape: f32[3,128], index: 4, kind: input, shape index: {}]   ;;  %s1821_s5 = inlined_call_operand.hbm [shape: bf16[128,128], index: 5, kind: input, shape index: {}]   ;;  %s1822_s6 = inlined_call_operand.vmem [shape: f32[3,128], index: 6, kind: input, shape index: {}]   ;;  %s1823_s7 = inlined_call_operand.hbm [shape: bf16[128,128], index: 7, kind: input, shape index: {}]   ;;  %s1824_s8 = inlined_call_operand.vmem [shape: f32[1,128], index: 8, kind: input, shape index: {}]   ;;  %s1825_s9 = inlined_call_operand.hbm [shape: f32[24,128], index: 9, kind: output, shape index: {}]  }
   0x1   :  { %15 = vsyncpa [#allocation6], 0 }
   0x2   :  { %16 = vsyncpa [#allocation4], 0 }
   0x3   :  { %18 = vsyncpa [#allocation4 + $0x1], 0  ;;  %s1584_s30 = smov 0   ;;  %s1586_s10 = smov 0  }
   0x4   :  { %s1588_s11 = smov 0   ;;  %s1590_s12 = smov 0  }
   0x5 LB: > { %s1605_s13 = sadd.s32 4294967295, %s1524_s12   ;;  %s1075_s14 = sadd.s32 4294967294, %s1524_s12   ;;  %s1524_s12 = sphi %s1590_s12, %s1841_s12   ;;  %s1520_s11 = sphi %s1588_s11, %s1840_s11   ;;  %s1516_s10 = sphi %s1586_s10, %s1839_s10   ;;  %s1512_s30 = sphi %s1584_s30, %s1838_s30  }
   0x6   : > { %s1609_s15 = sadd.s32 1, %s1524_s12   ;;  %s225_s16 = sadd.s32 1, %s1520_s11 }
   0x7   : > { %s222_s17 = ssub.s32 %s1524_s12, %s1609_s15  ;;  %p235_p0 = scmp.ne.s32.totalorder %s1520_s11, %s1516_s10 }
   0x8   : > { %p223_p1 = scmp.eq.s32.totalorder %s222_s17, 0  ;;  %p236_p2 = scmp.eq.s32.totalorder %s1605_s13, 2 }
   0x9   : > { %p241_p3 = scmp.ne.s32.totalorder %s1516_s10, %s1512_s30  ;;  %p242_p4 = scmp.eq.s32.totalorder %s1075_s14, 2 }
   0xa   : > { %s1620_s18 = scalar_select %p223_p1, %s1520_s11, %s225_s16  }
   0xb   : > { %p1622_p5 = por %p236_p2, %p235_p0  ;;  %p1626_p6 = por %p242_p4, %p241_p3 }
   0xc   : > { %p1076_p7 = scmp.ge.s32.totalorder %s1524_s12, 1  ;;  %p249_p8 = scmp.lt.s32.totalorder %s1524_s12, 4 }
   0xd   : > { %s1828_s19 = scalar_select %p1622_p5, 1, 0 }
   0xe   : > { %s1829_s20 = scalar_select %p1626_p6, 1, 0 }
   0xf   : > { %p1826_p9 = scmp.eq.s32.totalorder %s1605_s13, 0  ;;  %p1633_p10 = pnand %p1076_p7, %p249_p8 }
  0x10   : > { %s1526_s22 = smov [#allocation5]   ;;  %s1527_s25 = smov [#allocation2]  }
  0x11   : > { %p1266_p11 = pneg %p1633_p10  ;;  %s283_s23 = sshll.u32 %s1526_s22, 4  ;;  %s284_s23 = int_to_ptr.vmem [resolvable:$true] %s283_s23 }
  0x12   : > { %s261_s26 = sshll.u32 %s1527_s25, 4  ;;  %s1528_s27 = smov [#allocation7]   ;;  %s262_s26 = int_to_ptr.vmem [resolvable:$true] %s261_s26 }
  0x13   : > { %p1641_p12 = pnand %p1826_p9, %p1266_p11  ;;  %s299_s28 = sshll.u32 %s1528_s27, 4  ;;  %s300_s28 = int_to_ptr.vmem [resolvable:$true] %s299_s28 }
  0x14   : > { %s1389_s29 = scalar_lea.vmem %s284_s23, 1024  ;;  %p1397_p3 = scmp.lt.s32.totalorder %s284_s23, %s284_s23 }
  0x15   : > { %p1380_p13 = pneg %p1641_p12  ;;  %p1390_p0 = scmp.ne.s32.totalorder %s284_s23, %s1389_s29 }
  0x16   : > { %p1398_p4 = scmp.lt.s32.totalorder %s1389_s29, %s1389_s29 }
  0x17   : > { %p1392_p1 = pnand %p1390_p0, %p1380_p13 }
  0x18   : > { %p1399_p7 = por %p1398_p4, %p1397_p3 }
  0x19   : > { %p1393_p2 = pneg %p1392_p1 }
  0x1b   : > { %p1400_p8 = pnand %p1399_p7, %p1393_p2 }
  0x1d   : > { %1403 = shalt.err (!%p1400_p8)
}
  0x1e   : > { %s1529_s14 = smov 64   ;;  %s1530_s16 = smov 4  }
  0x1f   : > { %1272 = dma.hbm_to_vmem [thread:$0]  (!%p1641_p12), %s1821_s5, 1024, %s284_s23, [#allocation6], %s1529_s14, %s1529_s14, %s1530_s16  }
  0x20   : > { %s1415_s25 = scalar_lea.vmem %s262_s26, 2048  ;;  %p1423_p9 = scmp.lt.s32.totalorder %s262_s26, %s262_s26 }
  0x21   : > { %p1416_p11 = scmp.ne.s32.totalorder %s262_s26, %s1415_s25  ;;  %p1424_p6 = scmp.lt.s32.totalorder %s1415_s25, %s1415_s25 }
  0x23   : > { %p1418_p0 = pnand %p1416_p11, %p1380_p13  ;;  %p1425_p3 = por %p1424_p6, %p1423_p9 }
  0x25   : > { %p1419_p1 = pneg %p1418_p0 }
  0x27   : > { %p1426_p2 = pnand %p1425_p3, %p1419_p1 }
  0x29   : > { %1429 = shalt.err (!%p1426_p2)
}
  0x2a   : > { %1269 = dma.hbm_to_vmem [thread:$0]  (!%p1641_p12), %s1817_s1, 2048, %s262_s26, [#allocation3], %s1529_s14, %s1529_s14, %s1530_s16  }
  0x2b   : > { %s1441_s23 = scalar_lea.vmem %s300_s28, 1024  ;;  %p1449_p11 = scmp.lt.s32.totalorder %s300_s28, %s300_s28 }
  0x2c   : > { %p1442_p4 = scmp.ne.s32.totalorder %s300_s28, %s1441_s23  ;;  %p1450_p0 = scmp.lt.s32.totalorder %s1441_s23, %s1441_s23 }
  0x2e   : > { %p1444_p7 = pnand %p1442_p4, %p1380_p13  ;;  %p1451_p5 = por %p1450_p0, %p1449_p11 }
  0x30   : > { %p1445_p8 = pneg %p1444_p7 }
  0x32   : > { %p1452_p6 = pnand %p1451_p5, %p1445_p8 }
  0x34   : > { %1455 = shalt.err (!%p1452_p6)
}
  0x35   : > { %1275 = dma.hbm_to_vmem [thread:$0]  (!%p1641_p12), %s1823_s7, 1024, %s300_s28, [#allocation6], %s1529_s14, %s1529_s14, %s1530_s16  }
  0x36   : > { %326 = sbr.rel (%p1633_p10) target bundleno = 1878 (0x756), region = 56  ;;  %p1832_p9 = scmp.eq.s32.totalorder (!%p1633_p10), %s1605_s13, 0 }
  0x3b   : > { %1499 = dma.done.wait (%p1832_p9), [#allocation3], 2048   ;;  %p1833_p13 = pmov %p1832_p9 }
  0x3c   : > { %p1834_p1 = pmov %p1832_p9 }
  0x3d   : > { %1501 = vsyncadd (%p1833_p13), [#allocation3], 4294965248 }
  0x3e   : > { %1503 = dma.done.wait (%p1834_p1), [#allocation6], 2048   ;;  %p1835_p5 = pmov %p1834_p1 }
  0x3f   : > { %v1326_v0 = vld [vmem:[#allocation2 + $0x78] sm:$0xff]   ;;  %v1328_v2 = vld [vmem:[#allocation2 + $0x70] sm:$0xff]   ;;  %p370_p12 = scmp.lt.s32.totalorder %s1605_s13, 2  ;;  %v1330_v4 = vld [vmem:[#allocation2 + $0x68] sm:$0xff]   ;;  %v1531_v33 = vmov 0.0   ;;  %vm1532_vm0 = vmmov 0  }
  0x40   : > { %1505 = vsyncadd (%p1835_p5), [#allocation6], 4294965248  ;;  %v1327_v1 = vld [vmem:[#allocation2 + $0x38] sm:$0xff]   ;;  %1143 = vmatprep.subr.bf16.mxu0 %v1326_v0  ;;  %v1329_v3 = vld [vmem:[#allocation2 + $0x30] sm:$0xff]   ;;  %1192 = vmatprep.subr.bf16.mxu1 %v1531_v33  ;;  %s367_s28 = sand.u32 1, %s1516_s10   ;;  %s1139_s27 = sshll.u32 %s1605_s13, 7 }
  0x41   : > { %1144 = vmatpush3.bf16.msra.mxu0 %v1327_v1  ;;  %s371_s21 = scalar_select %p370_p12, %s1605_s13, 2  ;;  %v1331_v5 = vld [vmem:[#allocation2 + $0x28] sm:$0xff]   ;;  %v1332_v6 = vld [vmem:[#allocation2 + $0x60] sm:$0xff]   ;;  %v1334_v8 = vld [vmem:[#allocation2 + $0x58] sm:$0xff]   ;;  %1208 = vmatprep.mubr.msk.bf16.mxu1 %vm1532_vm0, %v1531_v33 }
  0x42   : > { %1145 = vmatprep.subr.bf16.mxu0 %v1328_v2  ;;  %v1333_v7 = vld [vmem:[#allocation2 + $0x20] sm:$0xff]   ;;  %v1335_v9 = vld [vmem:[#allocation2 + $0x18] sm:$0xff]   ;;  %v1336_v10 = vld [vmem:[#allocation2 + $0x50] sm:$0xff]   ;;  %p1836_p3 = scmp.ne.s32.totalorder %s1828_s19, 0  ;;  %s1533_s13 = smov [#allocation8]  }
  0x43   : > { %s1142_s24 = sshll.u32 %s371_s21, 4  ;;  %v1337_v12 = vld [vmem:[#allocation2 + $0x10] sm:$0xff]   ;;  %v1338_v14 = vld [vmem:[#allocation2 + $0x48] sm:$0xff]   ;;  %v1340_v16 = vld [vmem:[#allocation2 + $0x40] sm:$0xff]   ;;  %s1775_s21 = scalar_lea.hbm %s1825_s9, %s1139_s27 }
  0x44   : > { %s374_s14 = scalar_lea.vmem %s1816_s0, %s1142_s24  ;;  %v1339_v15 = vld [vmem:[#allocation2 + $0x8] sm:$0xff]   ;;  %v1341_v17 = vld [vmem:[#allocation2] sm:$0xff]   ;;  %v1342_v32 = vld [vmem:[%s1819_s3 + $0x38] sm:$0xff]   ;;  %s972_s24 = scalar_lea.sflag [#allocation4], %s367_s28 }
  0x45   : > { %1146 = vmatpush3.bf16.msra.mxu0 %v1329_v3  ;;  %v377_v11 = vld [vmem:[%s374_s14 + $0x8] sm:$0xff]  ;;  %v376_v18 = vld [vmem:[%s374_s14] sm:$0xff]  ;;  %1193 = vmatpush3.bf16.msra.mxu1 %v1342_v32  ;;  %v1343_v34 = vld [vmem:[%s1819_s3 + $0x30] sm:$0xff]   ;;  %s1085_s14 = sshll.u32 %s367_s28, 3 }
  0x46   : > { %1147 = vmatprep.subr.bf16.mxu0 %v1330_v4  ;;  %v379_v13 = vpack.c.bf16 %v377_v11, %v377_v11  ;;  %v378_v19 = vpack.c.bf16 %v376_v18, %v376_v18  ;;  %v1088_v21 = vld [vmem:[%s1818_s2] ss:$0 sm:$0xff]  ;;  %1194 = vmatprep.subr.bf16.mxu1 %v1531_v33  ;;  %v1344_v39 = vld [vmem:[%s1819_s3 + $0x28] sm:$0xff]   ;;  %v1346_v41 = vld [vmem:[%s1819_s3 + $0x18] sm:$0xff]   ;;  %s369_s29 = scalar_lea.vmem [#allocation8], %s1085_s14  ;;  %s1460_s14 = sshll.u32 %s1533_s13, 4  ;;  %s1461_s14 = int_to_ptr.vmem [resolvable:$false] %s1460_s14 }
  0x47   : > { %v1345_v40 = vld [vmem:[%s1819_s3 + $0x20] sm:$0xff]   ;;  %v1347_v42 = vld [vmem:[%s1819_s3 + $0x10] sm:$0xff]   ;;  %v1348_v43 = vld [vmem:[%s1819_s3 + $0x8] sm:$0xff]   ;;  %s985_s23 = sshll.u32 %s369_s29, 4  ;;  %s1462_s16 = scalar_lea.vmem %s1461_s14, 256  ;;  %s1777_s23 = int_to_ptr.vmem [resolvable:$true] %s985_s23 }
  0x48   : > { %545 = vmatprep.mubr.bf16.mxu0 %v379_v13  ;;  %v1349_v44 = vld [vmem:[%s1819_s3] sm:$0xff]   ;;  %v1350_v2 = vld [vmem:[#allocation5 + $0x38] sm:$0xff]   ;;  %v1351_v3 = vld [vmem:[#allocation5 + $0x30] sm:$0xff]   ;;  %s1456_s26 = scalar_lea.vmem %s1777_s23, 128  ;;  %p1463_p7 = scmp.lt.s32.totalorder %s1777_s23, %s1461_s14 }
  0x49   : > { %1148 = vmatpush3.bf16.msra.mxu0 %v1331_v5  ;;  %1195 = vmatpush3.bf16.msra.mxu1 %v1343_v34  ;;  %v1105_v49 = vld [vmem:[%s1818_s2 + $0x1] ss:$0 sm:$0xff]  ;;  %v1106_v51 = vld [vmem:[%s1818_s2 + $0x2] ss:$0 sm:$0xff]  ;;  %v1107_v55 = vld [vmem:[%s1820_s4] ss:$0 sm:$0xff]  ;;  %p1457_p10 = scmp.ne.s32.totalorder %s1777_s23, %s1456_s26  ;;  %p1464_p8 = scmp.lt.s32.totalorder %s1462_s16, %s1456_s26 }
  0x4a   : > { %1149 = vmatprep.subr.bf16.mxu0 %v1332_v6  ;;  %1196 = vmatprep.subr.bf16.mxu1 %v1531_v33  ;;  %v1355_v11 = vld [vmem:[#allocation5 + $0x10] sm:$0xff]   ;;  %v1357_v13 = vld [vmem:[#allocation5] sm:$0xff]  }
  0x4b   : > { %v1116_v18 = vld [vmem:[%s1820_s4 + $0x1] ss:$0 sm:$0xff]  ;;  %p1458_p2 = pnand %p1457_p10, %p1836_p3  ;;  %p1465_p11 = por %p1464_p8, %p1463_p7 }
  0x4d   : > { %1150 = vmatpush3.bf16.msra.mxu0 %v1333_v7  ;;  %1197 = vmatpush3.bf16.msra.mxu1 %v1344_v39  ;;  %p1459_p4 = pneg %p1458_p2 }
  0x4e   : > { %1151 = vmatprep.subr.bf16.mxu0 %v1334_v8  ;;  %1198 = vmatprep.subr.bf16.mxu1 %v1531_v33  ;;  %v1352_v8 = vld [vmem:[#allocation5 + $0x28] sm:$0xff]  }
  0x4f   : > { %p1466_p0 = pnand %p1465_p11, %p1459_p4 }
  0x51   : > { %1152 = vmatpush3.bf16.msra.mxu0 %v1335_v9  ;;  %1199 = vmatpush3.bf16.msra.mxu1 %v1345_v40  ;;  %v1353_v9 = vld [vmem:[#allocation5 + $0x20] sm:$0xff]  }
  0x52   : > { %1153 = vmatprep.subr.bf16.mxu0 %v1336_v10  ;;  %1200 = vmatprep.subr.bf16.mxu1 %v1531_v33  ;;  %v1354_v10 = vld [vmem:[#allocation5 + $0x18] sm:$0xff]  }
  0x55   : > { %1154 = vmatpush3.bf16.msra.mxu0 %v1337_v12  ;;  %1201 = vmatpush3.bf16.msra.mxu1 %v1346_v41  ;;  %v1356_v12 = vld [vmem:[#allocation5 + $0x8] sm:$0xff]  }
  0x56   : > { %1155 = vmatprep.subr.bf16.mxu0 %v1338_v14  ;;  %1202 = vmatprep.subr.bf16.mxu1 %v1531_v33 }
  0x59   : > { %1156 = vmatpush3.bf16.msra.mxu0 %v1339_v15  ;;  %1203 = vmatpush3.bf16.msra.mxu1 %v1347_v42  ;;  %v1360_v42 = vld [vmem:[#allocation7 + $0x28] sm:$0xff]  }
  0x5a   : > { %1157 = vmatprep.subr.bf16.mxu0 %v1340_v16  ;;  %1204 = vmatprep.subr.bf16.mxu1 %v1531_v33 }
  0x5d   : > { %1158 = vmatpush3.bf16.msra.mxu0 %v1341_v17  ;;  %1205 = vmatpush3.bf16.msra.mxu1 %v1348_v43  ;;  %v1361_v43 = vld [vmem:[#allocation7 + $0x20] sm:$0xff]  }
  0x5e   : > { %1212 = vmatprep.subr.bf16.mxu0 %v1531_v33  ;;  %1206 = vmatprep.subr.bf16.mxu1 %v1531_v33 }
  0x60   : > { %546 = vmatmul.mubr.bf16.vlgmr.msra.gmra.mxu0 %v378_v19 }
  0x61   : > { %1228 = vmatprep.mubr.msk.bf16.mxu0 %vm1532_vm0, %v1531_v33  ;;  %1207 = vmatpush3.bf16.msra.mxu1 %v1349_v44  ;;  %v1362_v44 = vld [vmem:[#allocation7 + $0x18] sm:$0xff]  }
  0x62   : > { %1232 = vmatprep.subr.bf16.mxu1 %v1531_v33  ;;  %1213 = vmatpush3.bf16.msra.mxu0 %v1350_v2 }
  0x63   : > { %1214 = vmatprep.subr.bf16.mxu0 %v1531_v33 }
  0x66   : > { %1215 = vmatpush3.bf16.msra.mxu0 %v1351_v3 }
  0x67   : > { %1216 = vmatprep.subr.bf16.mxu0 %v1531_v33 }
  0x6a   : > { %1217 = vmatpush3.bf16.msra.mxu0 %v1352_v8 }
  0x6b   : > { %1218 = vmatprep.subr.bf16.mxu0 %v1531_v33 }
  0x6e   : > { %1219 = vmatpush3.bf16.msra.mxu0 %v1353_v9 }
  0x6f   : > { %1220 = vmatprep.subr.bf16.mxu0 %v1531_v33 }
  0x72   : > { %1221 = vmatpush3.bf16.msra.mxu0 %v1354_v10 }
  0x73   : > { %1222 = vmatprep.subr.bf16.mxu0 %v1531_v33 }
  0x76   : > { %1223 = vmatpush3.bf16.msra.mxu0 %v1355_v11 }
  0x77   : > { %1224 = vmatprep.subr.bf16.mxu0 %v1531_v33 }
  0x7a   : > { %1225 = vmatpush3.bf16.msra.mxu0 %v1356_v12 }
  0x7b   : > { %1226 = vmatprep.subr.bf16.mxu0 %v1531_v33 }
  0x7e   : > { %1227 = vmatpush3.bf16.msra.mxu0 %v1357_v13 }
 0x120   : > { %v1159_v20 = vpop.f32.mrf.mxu0 }
 0x122   : > { %v1160_v22 = vpop.f32.mrf.mxu0 }
 0x123   : > { %v1161_v23 = vadd.f32 %v1160_v22, %v1159_v20  ;;  %v1117_v20 = vld [vmem:[%s1820_s4 + $0x2] ss:$0 sm:$0xff] }
 0x124   : > { %v1162_v24 = vpop.f32.mrf.mxu0 }
 0x125   : > { %v548_v25 = vadd.f32 %v1161_v23, %v1088_v21  ;;  %v1118_v24 = vld [vmem:[%s1822_s6] ss:$0 sm:$0xff] }
 0x126   : > { %v1163_v26 = vpop.f32.mrf.mxu0 }
 0x127   : > { %v554_v27 = vmul.f32 0.70710677, %v548_v25  ;;  %v553_v29 = vmul.f32 0.5, %v548_v25 }
 0x129   : > { %1366 = verf.f32 %v554_v27 }
 0x136   : > { %v1367_v28 = vpop.eup %1366 }
 0x137   : > { %v556_v30 = vadd.f32 1.0, %v1367_v28 }
 0x139   : > { %v557_v31 = vmul.f32 %v556_v30, %v553_v29 }
 0x13b   : > { %558 = vadd.xlane.f32.xlu0 %v557_v31 }
 0x1c4   : > { %v559_v35 = vpop.xlane.xlu0 %558 }
 0x1c5   : > { %v561_v36 = vmul.f32 0.0078125, %v559_v35 }
 0x1c7   : > { %v562_v37 = vsub.f32 %v557_v31, %v561_v36  ;;  %v1358_v36 = vld [vmem:[#allocation7 + $0x38] sm:$0xff]  }
 0x1c9   : > { %v563_v38 = vmul.f32 %v562_v37, %v562_v37 }
 0x1cb   : > { %564 = vadd.xlane.f32.xlu0 %v563_v38 }
 0x254   : > { %v565_v45 = vpop.xlane.xlu0 %564 }
 0x255   : > { %v566_v46 = vmul.f32 0.0078125, %v565_v45  ;;  %v1363_v45 = vld [vmem:[#allocation7 + $0x10] sm:$0xff]  }
 0x257   : > { %v567_v47 = vadd.f32 1e-05, %v566_v46  ;;  %v1364_v46 = vld [vmem:[#allocation7 + $0x8] sm:$0xff]  }
 0x259   : > { %1368 = vrsqrt.f32 %v567_v47  ;;  %v1365_v47 = vld [vmem:[#allocation7] sm:$0xff]  }
 0x266   : > { %v1369_v48 = vpop.eup %1368 }
 0x267   : > { %v569_v50 = vmul.f32 %v1369_v48, %v562_v37  ;;  %v1359_v37 = vld [vmem:[#allocation7 + $0x30] sm:$0xff]  }
 0x269   : > { %v575_v52 = vmul.f32 %v1105_v49, %v569_v50 }
 0x26b   : > { %v581_v53 = vadd.f32 %v1106_v51, %v575_v52  ;;  %v1127_v52 = vld [vmem:[%s1822_s6 + $0x1] ss:$0 sm:$0xff] }
 0x26d   : > { %v582_v54 = vpack.c.bf16 %v581_v53, %v581_v53 }
 0x26f   : > { %1209 = vmatmul.mubr.bf16.vlgmr.msra.gmra.mxu1 %v582_v54  ;;  %v1128_v54 = vld [vmem:[%s1822_s6 + $0x2] ss:$0 sm:$0xff] }
 0x270   : > { %1248 = vmatprep.mubr.msk.bf16.mxu1 %vm1532_vm0, %v1531_v33  ;;  %1233 = vmatpush3.bf16.msra.mxu1 %v1358_v36 }
 0x271   : > { %1234 = vmatprep.subr.bf16.mxu1 %v1531_v33 }
 0x274   : > { %1235 = vmatpush3.bf16.msra.mxu1 %v1359_v37 }
 0x275   : > { %1236 = vmatprep.subr.bf16.mxu1 %v1531_v33 }
 0x278   : > { %1237 = vmatpush3.bf16.msra.mxu1 %v1360_v42 }
 0x279   : > { %1238 = vmatprep.subr.bf16.mxu1 %v1531_v33 }
 0x27c   : > { %1239 = vmatpush3.bf16.msra.mxu1 %v1361_v43 }
 0x27d   : > { %1240 = vmatprep.subr.bf16.mxu1 %v1531_v33 }
 0x280   : > { %1241 = vmatpush3.bf16.msra.mxu1 %v1362_v44 }
 0x281   : > { %1242 = vmatprep.subr.bf16.mxu1 %v1531_v33 }
 0x284   : > { %1243 = vmatpush3.bf16.msra.mxu1 %v1363_v45 }
 0x285   : > { %1244 = vmatprep.subr.bf16.mxu1 %v1531_v33 }
 0x288   : > { %1245 = vmatpush3.bf16.msra.mxu1 %v1364_v46 }
 0x289   : > { %1246 = vmatprep.subr.bf16.mxu1 %v1531_v33  ;;  %v1129_v33 = vld [vmem:[%s1824_s8] ss:$0 sm:$0xff] }
 0x28c   : > { %1247 = vmatpush3.bf16.msra.mxu1 %v1365_v47 }
 0x32f   : > { %v686_v56 = vpop.f32.mrf.mxu1 }
 0x330   : > { %v687_v57 = vadd.f32 %v1107_v55, %v686_v56 }
 0x331   : > { %v1210_v58 = vpop.f32.mrf.mxu1 }
 0x332   : > { %v693_v59 = vmul.f32 0.70710677, %v687_v57  ;;  %v692_v63 = vmul.f32 0.5, %v687_v57 }
 0x333   : > { %v689_v60 = vpop.f32.mrf.mxu1 }
 0x334   : > { %1370 = verf.f32 %v693_v59 }
 0x335   : > { %v1211_v61 = vpop.f32.mrf.mxu1 }
 0x341   : > { %v1371_v62 = vpop.eup %1370 }
 0x342   : > { %v695_v0 = vadd.f32 1.0, %v1371_v62 }
 0x344   : > { %v696_v1 = vmul.f32 %v695_v0, %v692_v63 }
 0x346   : > { %697 = vadd.xlane.f32.xlu1 %v696_v1 }
 0x3cf   : > { %v698_v4 = vpop.xlane.xlu1 %697 }
 0x3d0   : > { %v699_v5 = vmul.f32 0.0078125, %v698_v4 }
 0x3d2   : > { %v700_v6 = vsub.f32 %v696_v1, %v699_v5 }
 0x3d4   : > { %v701_v7 = vmul.f32 %v700_v6, %v700_v6 }
 0x3d6   : > { %702 = vadd.xlane.f32.xlu1 %v701_v7 }
 0x45f   : > { %v703_v14 = vpop.xlane.xlu1 %702 }
 0x460   : > { %v704_v15 = vmul.f32 0.0078125, %v703_v14 }
 0x462   : > { %v705_v16 = vadd.f32 1e-05, %v704_v15 }
 0x464   : > { %1372 = vrsqrt.f32 %v705_v16 }
 0x471   : > { %v1373_v17 = vpop.eup %1372 }
 0x472   : > { %v707_v19 = vmul.f32 %v1373_v17, %v700_v6 }
 0x474   : > { %v713_v21 = vmul.f32 %v1116_v18, %v707_v19 }
 0x476   : > { %v719_v22 = vadd.f32 %v1117_v20, %v713_v21 }
 0x478   : > { %v720_v23 = vpack.c.bf16 %v719_v22, %v719_v22 }
 0x47a   : > { %1229 = vmatmul.mubr.bf16.vlgmr.msra.gmra.mxu0 %v720_v23 }
 0x53a   : > { %v824_v25 = vpop.f32.mrf.mxu0 }
 0x53b   : > { %v825_v26 = vadd.f32 %v1118_v24, %v824_v25 }
 0x53c   : > { %v1230_v27 = vpop.f32.mrf.mxu0 }
 0x53d   : > { %v831_v28 = vmul.f32 0.70710677, %v825_v26  ;;  %v830_v32 = vmul.f32 0.5, %v825_v26 }
 0x53e   : > { %v827_v29 = vpop.f32.mrf.mxu0 }
 0x53f   : > { %1374 = verf.f32 %v831_v28 }
 0x540   : > { %v1231_v30 = vpop.f32.mrf.mxu0 }
 0x54c   : > { %v1375_v31 = vpop.eup %1374 }
 0x54d   : > { %v833_v34 = vadd.f32 1.0, %v1375_v31 }
 0x54f   : > { %v834_v35 = vmul.f32 %v833_v34, %v830_v32 }
 0x551   : > { %835 = vadd.xlane.f32.xlu0 %v834_v35 }
 0x5da   : > { %v836_v38 = vpop.xlane.xlu0 %835 }
 0x5db   : > { %v837_v39 = vmul.f32 0.0078125, %v836_v38 }
 0x5dd   : > { %v838_v40 = vsub.f32 %v834_v35, %v837_v39 }
 0x5df   : > { %v839_v41 = vmul.f32 %v838_v40, %v838_v40 }
 0x5e1   : > { %840 = vadd.xlane.f32.xlu1 %v839_v41 }
 0x66a   : > { %v841_v48 = vpop.xlane.xlu1 %840 }
 0x66b   : > { %v842_v49 = vmul.f32 0.0078125, %v841_v48 }
 0x66d   : > { %v843_v50 = vadd.f32 1e-05, %v842_v49 }
 0x66f   : > { %1376 = vrsqrt.f32 %v843_v50 }
 0x67c   : > { %v1377_v51 = vpop.eup %1376 }
 0x67d   : > { %v845_v53 = vmul.f32 %v1377_v51, %v838_v40 }
 0x67f   : > { %v851_v55 = vmul.f32 %v1127_v52, %v845_v53 }
 0x681   : > { %v857_v56 = vadd.f32 %v1128_v54, %v851_v55 }
 0x683   : > { %v858_v57 = vpack.c.bf16 %v857_v56, %v857_v56 }
 0x685   : > { %1249 = vmatmul.mubr.bf16.vlgmr.msra.gmra.mxu1 %v858_v57 }
 0x745   : > { %v964_v58 = vpop.f32.mrf.mxu1 }
 0x746   : > { %v965_v59 = vadd.f32 %v1129_v33, %v964_v58 }
 0x747   : > { %v1250_v60 = vpop.f32.mrf.mxu1 }
 0x748   : > { %970 = vst [vmem:[%s369_s29] sm:$0xff] %v965_v59 }
 0x749   : > { %v967_v61 = vpop.f32.mrf.mxu1 }
 0x74a   : > { %1469 = shalt.err (!%p1466_p0)
}
 0x74b   : > { %s1470_s25 = scalar_lea.hbm %s1775_s21, 128  ;;  %s1474_s29 = scalar_lea.hbm %s1825_s9, 384 }
 0x74c   : > { %p1471_p6 = scmp.ne.s32.totalorder %s1775_s21, %s1470_s25  ;;  %p1475_p1 = scmp.lt.s32.totalorder %s1775_s21, %s1825_s9 }
 0x74d   : > { %p1476_p5 = scmp.lt.s32.totalorder %s1474_s29, %s1470_s25 }
 0x74e   : > { %p1472_p9 = pnand %p1471_p6, %p1836_p3 }
 0x74f   : > { %p1477_p12 = por %p1476_p5, %p1475_p1 }
 0x750   : > { %p1473_p13 = pneg %p1472_p9 }
 0x752   : > { %p1478_p10 = pnand %p1477_p12, %p1473_p13 }
 0x754   : > { %1481 = shalt.err (!%p1478_p10)
}
 0x755   : > { %1264 = dma.vmem_to_hbm [thread:$0]  (%p1836_p3), %s1777_s23, 128, %s1775_s21, %s972_s24   ;;  %v1251_v62 = vpop.f32.mrf.mxu1 }
 0x756 PF: > { %p1286_p2 = scmp.ge.s32.totalorder %s1524_s12, 2  ;;  %s997_s26 = sand.u32 1, %s1512_s30  }
 0x757   : > { %p1837_p4 = scmp.ne.s32.totalorder %s1829_s20, 0  ;;  %s998_s13 = scalar_lea.sflag [#allocation4], %s997_s26 }
 0x759   : > { %p1277_p7 = pnand %p1286_p2, %p1837_p4 }
 0x75b   : > { %p1278_p8 = pneg %p1277_p7 }
 0x75d   : > { %1507 = dma.done.wait (%p1278_p8), %s998_s13, 128  }
 0x75e   : > { %1509 = vsyncadd (%p1278_p8), %s998_s13, 4294967168  ;;  %p21_p11 = scmp.ge.s32.totalorder %s1609_s15, 5   ;;  %s1838_s30 = smov %s1516_s10 }
 0x75f   : > { %s1839_s10 = smov %s1520_s11  ;;  %s1840_s11 = smov %s1620_s18 }
 0x760   : > { %s1841_s12 = smov %s1609_s15  ;;  %23 = sbr.rel (!%p21_p11) target bundleno = 5 (0x5), region = 104 }
 0x765   :  { %1003 = vsyncpa [#allocation3], 1 }
 0x766   :  { %1005 = vsyncpa [#allocation3 + $0x1], 1 }
 0x767   :  { %1006 = vsyncpa [#allocation6], 1 }
 0x768   :  { %1007 = vsyncpa [#allocation4], 1 }
 0x769   :  { %1009 = vsyncpa [#allocation4 + $0x1], 1 }

</bundles_post_ra>
